<compile_context>
chip_gen: v6e
topology: v6e:2x2x1
jax: 0.10.0
libtpu: 0.0.40
codegen_flags: <defaults>
</compile_context>

<pallas_src>
import functools

import jax
import jax.numpy as jnp
from jax.experimental import pallas as pl
from jax.experimental.pallas import tpu as pltpu

_LANES = 128
_SUBLANES = 8


def _attention_kernel(w_ref, x_ref, o_ref, *, rep):
    # w_ref: (1, dk) attention weights (already lane-replicated `rep` times when rep > 1).
    # x_ref / o_ref: (TB, dk) row tile of the (possibly lane-dense-reshaped) x.
    w = w_ref[...].astype(jnp.float32)                   # (1, dk)
    m = jnp.max(w, axis=-1, keepdims=True)               # numerically-stable softmax
    e = jnp.exp(w - m)                                   # (1, dk)
    s = jnp.sum(e, axis=-1, keepdims=True)               # == rep * (sum over original D)
    # softmax over the ORIGINAL D-vector, replicated across the dk lanes:
    #   exp(w_j - m) / sum_D == e_j * (rep / s);  rep is an exact power of two.
    sm = e * (jnp.float32(rep) / s)                      # (1, dk)
    xv = x_ref[...]                                      # (TB, dk), x's own dtype
    o_ref[...] = (xv * sm.astype(xv.dtype)).astype(o_ref.dtype)


def attention_module(x, attention_weights, *, target_rows=1024):
    """x: (B, D), attention_weights: (D,)  ->  (B, D) with out = x * softmax(w)."""
    B, D = x.shape
    out_dtype = x.dtype

    w = attention_weights.reshape(1, D).astype(jnp.float32)

    # ---- lane-dense view for small feature dims (only when the reshape is exact) ----
    if D < _LANES and _LANES % D == 0 and (B * D) % _LANES == 0:
        rep = _LANES // D
        dk = _LANES
        rows = (B * D) // _LANES
        x2 = x.reshape(rows, dk)                         # contiguous reshape: free
        w2 = jnp.tile(w, (1, rep))                       # tiny host-side tile -> (1, 128)
    else:
        rep = 1
        dk = D
        rows = B
        x2 = x
        w2 = w

    # ---- row-tile size: keep double-buffered (x + out) tiles well under VMEM ----
    bytes_per_row = dk * jnp.dtype(out_dtype).itemsize
    vmem_budget = 8 * 1024 * 1024                        # for the 4 pipelined row buffers
    max_rows = max(_SUBLANES, vmem_budget // (4 * max(bytes_per_row, 1)))
    tb = min(target_rows, rows, max_rows)
    if tb < rows:
        tb = max(_SUBLANES, (tb // _SUBLANES) * _SUBLANES)   # sublane-aligned tiles
    grid = (pl.cdiv(rows, tb),)

    kernel = functools.partial(_attention_kernel, rep=rep)
    out2 = pl.pallas_call(
        kernel,
        out_shape=jax.ShapeDtypeStruct((rows, dk), out_dtype),
        grid_spec=pltpu.PrefetchScalarGridSpec(
            num_scalar_prefetch=0,
            grid=grid,
            in_specs=[
                pl.BlockSpec((1, dk), lambda i: (0, 0)),      # weights: constant tiny block
                pl.BlockSpec((tb, dk), lambda i: (i, 0)),     # x: row tile (feature dim never split)
            ],
            out_specs=pl.BlockSpec((tb, dk), lambda i: (i, 0)),
        ),
        compiler_params=pltpu.CompilerParams(
            dimension_semantics=("parallel",),                # row tiles are independent
            vmem_limit_bytes=32 * 1024 * 1024,
        ),
    )(w2, x2)
    return out2.reshape(B, D)


def _reference(x, attention_weights):
    return x * jax.nn.softmax(attention_weights, axis=0)[None, :]


if __name__ == "__main__":
    key = jax.random.PRNGKey(0)
    k_w, k_x, k_w2, k_x2 = jax.random.split(key, 4)

    # --- small shape matching the module spec (lane-dense path: rows=1, 128 lanes) ---
    batch, input_dim = 4, 32
    attention_weights = jax.random.normal(k_w, (input_dim,), dtype=jnp.float32)
    x = jax.random.normal(k_x, (batch, input_dim), dtype=jnp.float32)

    out = jax.block_until_ready(attention_module(x, attention_weights))
    ref = _reference(x, attention_weights)
    assert jnp.allclose(out, ref, rtol=1e-3, atol=1e-5), "mismatch vs reference (small)"

    # --- moderate shape exercising the row-tiled, multi-step pipelined path ---
    b2, d2 = 2048, 256
    w_big = jax.random.normal(k_w2, (d2,), dtype=jnp.float32)
    x_big = jax.random.normal(k_x2, (b2, d2), dtype=jnp.float32)

    out_big = jax.block_until_ready(attention_module(x_big, w_big))
    ref_big = _reference(x_big, w_big)
    assert jnp.allclose(out_big, ref_big, rtol=1e-3, atol=1e-5), "mismatch vs reference (tiled)"

    # --- partial last tile (grid doesn't divide rows) ---
    out_part = jax.block_until_ready(attention_module(x_big, w_big, target_rows=768))
    assert jnp.allclose(out_part, ref_big, rtol=1e-3, atol=1e-5), "mismatch vs reference (partial tile)"

    print("KERNEL_OK")
</pallas_src>

<mosaic_0001>
module attributes {stable_mosaic.version = 11 : i64} {
  func.func @_attention_kernel(%arg0: i32, %arg1: memref<1x128xf32, #tpu.memory_space<vmem>>, %arg2: memref<1x128xf32, #tpu.memory_space<vmem>>, %arg3: memref<1x128xf32, #tpu.memory_space<vmem>>) attributes {dimension_semantics = [#tpu.dimension_semantics<parallel>], iteration_bounds = array<i64: 1>, scalar_prefetch = 0 : i64, scratch_operands = 0 : i64, tpu.core_type = #tpu.core_type<tc>, window_params = [{pipeline_mode = #tpu.pipeline_mode<synchronous>, transform_indices = @transform_0, window_bounds = array<i64: 1, 128>}, {transform_indices = @transform_1, window_bounds = array<i64: 1, 128>}, {transform_indices = @transform_2, window_bounds = array<i64: 1, 128>}]} {
    %c0 = arith.constant 0 : index
    %c0_0 = arith.constant 0 : index
    %0 = vector.load %arg1[%c0, %c0_0] : memref<1x128xf32, #tpu.memory_space<vmem>>, vector<1x128xf32>
    %cst = arith.constant dense<0xFF800000> : vector<1xf32>
    %1 = vector.multi_reduction <maximumf>, %0, %cst [1] : vector<1x128xf32> to vector<1xf32>
    %2 = vector.shape_cast %1 : vector<1xf32> to vector<1x1xf32>
    %3 = vector.broadcast %2 : vector<1x1xf32> to vector<1x128xf32>
    %4 = arith.subf %0, %3 : vector<1x128xf32>
    %5 = math.exp %4 : vector<1x128xf32>
    %cst_1 = arith.constant dense<0.000000e+00> : vector<1xf32>
    %6 = vector.multi_reduction <add>, %5, %cst_1 [1] : vector<1x128xf32> to vector<1xf32>
    %7 = vector.shape_cast %6 : vector<1xf32> to vector<1x1xf32>
    %cst_2 = arith.constant 4.000000e+00 : f32
    %8 = vector.broadcast %cst_2 : f32 to vector<1x1xf32>
    %9 = arith.divf %8, %7 : vector<1x1xf32>
    %10 = vector.broadcast %9 : vector<1x1xf32> to vector<1x128xf32>
    %11 = arith.mulf %5, %10 : vector<1x128xf32>
    %c0_3 = arith.constant 0 : index
    %c0_4 = arith.constant 0 : index
    %12 = vector.load %arg2[%c0_3, %c0_4] : memref<1x128xf32, #tpu.memory_space<vmem>>, vector<1x128xf32>
    %13 = arith.mulf %12, %11 : vector<1x128xf32>
    %c0_5 = arith.constant 0 : index
    %c0_6 = arith.constant 0 : index
    %14 = vector.load %arg3[%c0_5, %c0_6] : memref<1x128xf32, #tpu.memory_space<vmem>>, vector<1x128xf32>
    tpu.vector_store %arg3[%c0_5, %c0_6], %13 {strides = array<i32>} : memref<1x128xf32, #tpu.memory_space<vmem>>, vector<1x128xf32>,
    return
  }
  func.func @transform_0(%arg0: i32) -> (i32, i32) {
    %c0_i32 = arith.constant 0 : i32
    %c0_i32_0 = arith.constant 0 : i32
    %c0_i32_1 = arith.constant 0 : i32
    return %c0_i32, %c0_i32_0 : i32, i32
  }
  func.func @transform_1(%arg0: i32) -> (i32, i32) {
    %c0_i32 = arith.constant 0 : i32
    %c0_i32_0 = arith.constant 0 : i32
    return %arg0, %c0_i32 : i32, i32
  }
  func.func @transform_2(%arg0: i32) -> (i32, i32) {
    %c0_i32 = arith.constant 0 : i32
    %c0_i32_0 = arith.constant 0 : i32
    return %arg0, %c0_i32 : i32, i32
  }
}

</mosaic_0001>

<bundles_post_ra>
// kernel: tpu_custom_call.1
= control target key start
LH: loop header
LB: loop body
LE: loop exit
PB: predicated region body
PF: predicated region fallthrough
CT: control target
= control target key end

     0   :  { %7 = vsyncpa [#allocation3], 0  ;;  %s132_s0 = inlined_call_operand.hbm [shape: f32[1,128], index: 0, kind: input, shape index: {}]   ;;  %s133_s1 = inlined_call_operand.vmem [shape: f32[1,128], index: 1, kind: input, shape index: {}]   ;;  %s134_s2 = inlined_call_operand.hbm [shape: f32[1,128], index: 2, kind: output, shape index: {}]  }
   0x1   :  { %8 = vsyncpa [#allocation4], 0  ;;  %s106_s9 = smov [#allocation2]  }
   0x2   :  { %s15_s10 = sshll.u32 %s106_s9, 4  ;;  %s16_s10 = int_to_ptr.vmem [resolvable:$true] %s15_s10 }
   0x3   :  { %s70_s11 = scalar_lea.vmem %s16_s10, 16  ;;  %s74_s12 = scalar_lea.vmem %s16_s10, 32 }
   0x4   :  { %p71_p0 = scmp.ne.s32.totalorder %s16_s10, %s70_s11  ;;  %p75_p1 = scmp.lt.s32.totalorder %s16_s10, %s16_s10 }
   0x5   :  { %p76_p2 = scmp.lt.s32.totalorder %s74_s12, %s70_s11 }
   0x7   :  { %p77_p3 = por %p76_p2, %p75_p1 }
   0x9   :  { %p78_p4 = pnand %p77_p3, %p71_p0 }
   0xb   :  { %81 = shalt.err (!%p78_p4)
}
   0xc   :  { %18 = dma.hbm_to_vmem [thread:$0]  %s132_s0, 16, %s16_s10, [#allocation3]  }
   0xd   :  { %102 = dma.done.wait [#allocation3], 16  }
   0xe   :  { %103 = vsyncadd [#allocation3], 4294967280  ;;  %vm25_vm0 = vcmask 1040384   ;;  %v24_v0 = vld [vmem:[#allocation2] sm:$0x1]  ;;  %s107_s0 = smov [#allocation5]  }
   0xf   :  { %v26_v1 = vsel %vm25_vm0, %v24_v0, -inf  ;;  %v38_v10 = vld [vmem:[%s133_s1] sm:$0x1]  ;;  %s47_s17 = sshll.u32 %s107_s0, 4  ;;  %s48_s17 = int_to_ptr.vmem [resolvable:$true] %s47_s17 }
  0x10   :  { %27 = vmax.xlane.f32.xlu0 %v26_v1  ;;  %s82_s18 = scalar_lea.vmem %s48_s17, 16  ;;  %s86_s19 = scalar_lea.vmem %s48_s17, 32 }
  0x11   :  { %p83_p5 = scmp.ne.s32.totalorder %s48_s17, %s82_s18  ;;  %p87_p6 = scmp.lt.s32.totalorder %s48_s17, %s48_s17 }
  0x12   :  { %p88_p7 = scmp.lt.s32.totalorder %s86_s19, %s82_s18 }
  0x14   :  { %p89_p8 = por %p88_p7, %p87_p6 }
  0x16   :  { %p90_p9 = pnand %p89_p8, %p83_p5 }
  0x99   :  { %v28_v2 = vpop.xlane.xlu0 %27 }
  0x9a   :  { %v29_v3 = vsub.f32 %v24_v0, %v28_v2 }
  0x9c   :  { %v30_v4 = vmul.f32 1.442695, %v29_v3 }
  0x9e   :  { %58 = vpow2.f32 %v30_v4 }
  0xab   :  { %v59_v5 = vpop.eup %58 }
  0xac   :  { %v32_v6 = vsel %vm25_vm0, %v59_v5, 0.0 }
  0xad   :  { %33 = vadd.xlane.f32.xlu0 %v32_v6 }
 0x136   :  { %v34_v7 = vpop.xlane.xlu0 %33 }
 0x137   :  { %60 = vrcp.f32 %v34_v7 }
 0x144   :  { %v61_v8 = vpop.eup %60 }
 0x145   :  { %v36_v9 = vmul.f32 4.0, %v61_v8 }
 0x147   :  { %v37_v11 = vmul.f32 %v59_v5, %v36_v9 }
 0x149   :  { %v39_v12 = vmul.f32 %v38_v10, %v37_v11 }
 0x14b   :  { %40 = vst [vmem:[#allocation5] sm:$0x1] %v39_v12 }
 0x14c   :  { %93 = shalt.err (!%p90_p9)
}
 0x14d   :  { %50 = dma.vmem_to_hbm [thread:$0]  %s48_s17, 16, %s134_s2, [#allocation4]  }
 0x14e   :  { %104 = dma.done.wait [#allocation4], 16  }
 0x14f   :  { %105 = vsyncadd [#allocation4], 4294967280 }
 0x150   :  { %54 = vsyncpa [#allocation3], 1 }
 0x151   :  { %55 = vsyncpa [#allocation4], 1 }

</bundles_post_ra>
